<compile_context>
chip_gen: v5e
topology: v5e:2x2
jax: 0.10.0
libtpu: 0.0.40
codegen_flags: <defaults>
</compile_context>

<pallas_src>
import functools

import jax
import jax.numpy as jnp
from jax.experimental import pallas as pl
from jax.experimental.pallas import tpu as pltpu


def _round_up(x, m):
    return (x + m - 1) // m * m


def _act(x, activation):
    if activation == "relu":
        return jnp.maximum(x, 0.0)
    elif activation == "swish":
        # SiLU: x * sigmoid(x). exp runs on the EUP slot, next to MXU work.
        return x * (1.0 / (1.0 + jnp.exp(-x)))
    raise ValueError(f"unsupported activation: {activation}")


def _block_pair(h, w1, b1, w2, b2, cdt, activation):
    """One residual block: h + Linear(act(Linear(act(h)))).  Dropout = identity (eval).

    h is f32; matmul inputs are cast to `cdt` (bf16 by default); accumulation is f32.
    """
    t = _act(h, activation).astype(cdt)
    t = jnp.dot(t, w1, preferred_element_type=jnp.float32) + b1
    t = _act(t, activation).astype(cdt)
    t = jnp.dot(t, w2, preferred_element_type=jnp.float32) + b2
    return h + t


def _row_slice(s, sub_m):
    start = s * sub_m
    if not isinstance(start, int):
        start = pl.multiple_of(start, sub_m)
    return pl.ds(start, sub_m)


def _foreach_subtile(n_sub, body):
    """Run body(s) for s in [0, n_sub). Unrolled fori_loop bounds live ranges per
    sub-tile and keeps the LLO scheduler's view local."""
    if n_sub == 1:
        body(0)
    else:
        def wrapped(s, carry):
            body(s)
            return carry
        jax.lax.fori_loop(0, n_sub, wrapped, 0, unroll=True)


# ----------------------------------------------------------------------------------
# Kernels
# ----------------------------------------------------------------------------------
def _resident_kernel(x_ref, wp_ref, bp_ref, w_ref, b_ref, o_ref, *,
                     num_pairs, sub_m, activation):
    """Weight-resident path: whole (L,H,H) stack lives in VMEM; 1-D batch grid.

    x_ref : (tm, D_in) f32    wp_ref: (D_in, H)    bp_ref: (1, H) f32
    w_ref : (L, H, H)         b_ref : (L, 1, H) f32       o_ref: (tm, H)
    """
    cdt = w_ref.dtype                       # MXU input dtype; accumulation stays f32.
    n_sub = x_ref.shape[0] // sub_m

    def body(s):
        rows = _row_slice(s, sub_m)
        h = jnp.dot(x_ref[rows, :].astype(cdt), wp_ref[...],
                    preferred_element_type=jnp.float32) + bp_ref[...]
        for p in range(num_pairs):
            h = _block_pair(h, w_ref[2 * p], b_ref[2 * p],
                            w_ref[2 * p + 1], b_ref[2 * p + 1], cdt, activation)
        o_ref[rows, :] = h.astype(o_ref.dtype)

    _foreach_subtile(n_sub, body)


def _streaming_kernel(x_ref, wp_ref, bp_ref, w_ref, b_ref, o_ref, h_ref, *,
                      sub_m, activation):
    """Weight-streaming path: 2-D grid (batch i, layer-pair p); one (2,H,H) pair of
    weights is DMA'd per step (double-buffered); h is carried in VMEM scratch.

    x_ref : (tm, D_in) f32    wp_ref: (D_in, H)    bp_ref: (1, H) f32
    w_ref : (2, H, H)         b_ref : (2, 1, H) f32
    o_ref : (tm, H)           h_ref : (tm, H) f32 VMEM scratch (persists across grid)
    """
    cdt = w_ref.dtype
    p = pl.program_id(1)
    is_first = p == 0
    is_last = p == pl.num_programs(1) - 1
    n_sub = x_ref.shape[0] // sub_m

    def body(s):
        rows = _row_slice(s, sub_m)

        @pl.when(is_first)
        def _():
            h_ref[rows, :] = (
                jnp.dot(x_ref[rows, :].astype(cdt), wp_ref[...],
                        preferred_element_type=jnp.float32) + bp_ref[...])

        h = _block_pair(h_ref[rows, :], w_ref[0], b_ref[0],
                        w_ref[1], b_ref[1], cdt, activation)
        h_ref[rows, :] = h

        @pl.when(is_last)
        def _():
            o_ref[rows, :] = h.astype(o_ref.dtype)

    _foreach_subtile(n_sub, body)


# ----------------------------------------------------------------------------------
# Parameter prep (one-time, NOT per forward call)
# ----------------------------------------------------------------------------------
def prepare_resnet_params(wp, bp, w_stack, b_stack, *, weight_dtype=jnp.bfloat16):
    """One-time parameter prep. Call once per parameter set, never per forward.

    wp      : (D_in, H)  projection weight, pre-transposed (in, out)
    bp      : (H,) or (1, H)
    w_stack : (L, H, H)  block weights, pre-transposed, L even
    b_stack : (L, H) or (L, 1, H)
    weight_dtype : MXU input dtype for the weights. Default bf16 (2-4x MXU throughput,
        half the weight VMEM/DMA bytes). NOTE: activations are also cast to this dtype
        right before each matmul, so error compounds over the L layers; accumulation
        and all bias/activation/residual math stay f32. Pass jnp.float32 for exact f32.
    """
    D_in, H = wp.shape
    L = w_stack.shape[0]
    assert L % 2 == 0 and L >= 2, "hidden_sizes must have even length"
    assert w_stack.shape == (L, H, H)
    return {
        "wp": jnp.asarray(wp, weight_dtype),
        "bp": jnp.asarray(bp, jnp.float32).reshape(1, H),
        "w": jnp.asarray(w_stack, weight_dtype),
        "b": jnp.asarray(b_stack, jnp.float32).reshape(L, 1, H),
    }


def _vmem_budget_bytes():
    """~85% of per-core VMEM; conservative 64 MiB (v7x per-TC) fallback if unknown."""
    phys = 64 * 2 ** 20
    try:
        info = pltpu.get_tpu_info()
        cap = int(getattr(info, "vmem_capacity_bytes", 0) or 0)
        if cap > 0:
            phys = cap
    except Exception:
        pass
    return int(phys * 0.85)


# ----------------------------------------------------------------------------------
# Forward wrapper
# ----------------------------------------------------------------------------------
def resnet_layer_forward(x, params, *, tm=None, stream_weights=None, activation="relu"):
    """ResNetLayer forward.

    x      : (B, D_in) f32
    params : dict from prepare_resnet_params
    tm     : batch tile (rows per grid step). Default 128 (256 when B >= 512); raise to
             256-512 on v6e for large B. Values > 128 are rounded to multiples of 128.
    stream_weights : None -> auto (stream when the resident (L,H,H) stack would use
             >40% of the VMEM budget, e.g. v7x with production H/L); True/False forces.
    Returns (B, H) in x.dtype.
    """
    wp, bp, w_stack, b_stack = params["wp"], params["bp"], params["w"], params["b"]
    B, D_in = x.shape
    Dw, H = wp.shape
    L = w_stack.shape[0]
    assert Dw == D_in, "input_dim mismatch with projection weight"
    assert bp.shape == (1, H) and b_stack.shape == (L, 1, H)
    assert L % 2 == 0

    wbytes = wp.dtype.itemsize
    budget = _vmem_budget_bytes()

    # ---- batch tile ---------------------------------------------------------------
    if tm is None:
        tm = 256 if B >= 512 else 128
        # Guarantee >= 2 grid steps along the batch axis so the 'parallel' axis can
        # shard across v7x's two TensorCores even for small batches.
        if B > 8 and pl.cdiv(B, tm) < 2:
            tm = _round_up(pl.cdiv(B, 2), 8)
    tm = max(8, min(int(tm), _round_up(B, 8)))
    tm = _round_up(tm, 128) if tm > 128 else _round_up(tm, 8)
    sub_m = min(128, tm)               # M sub-tile: bounds vreg live-ranges in-kernel
    assert tm % sub_m == 0
    n_tiles = pl.cdiv(B, tm)

    # ---- resident vs streaming weights ---------------------------------------------
    resident_w_bytes = (D_in * H + L * H * H) * wbytes + (L + 1) * H * 4
    if stream_weights is None:
        stream_weights = (L >= 4) and (resident_w_bytes > 0.4 * budget)

    # ---- VMEM accounting ------------------------------------------------------------
    act_bytes = 2 * tm * D_in * x.dtype.itemsize + 2 * tm * H * x.dtype.itemsize
    live_bytes = 3 * sub_m * H * 4                     # h / x_start / t spill headroom
    if stream_weights:
        w_vmem = (D_in * H * wbytes + H * 4            # projection (single-buffered)
                  + 2 * (2 * H * H * wbytes + 2 * H * 4))  # pair, double-buffered
        scratch_bytes = tm * H * 4                     # carried h
    else:
        w_vmem = resident_w_bytes
        scratch_bytes = 0
    vmem_est = act_bytes + w_vmem + scratch_bytes + live_bytes
    vmem_limit = int(min(budget, max(32 * 2 ** 20, 2 * vmem_est)))

    # ---- advisory cost estimate -------------------------------------------------------
    flops = 2 * B * (D_in + L * H) * H
    w_reads = n_tiles if stream_weights else 1
    bytes_accessed = int(x.size * x.dtype.itemsize
                         + w_reads * (wp.size + w_stack.size) * wbytes
                         + (bp.size + b_stack.size) * 4
                         + B * H * x.dtype.itemsize)
    cost = pl.CostEstimate(flops=int(flops), transcendentals=0,
                           bytes_accessed=bytes_accessed)

    out_shape = jax.ShapeDtypeStruct((B, H), x.dtype)

    if not stream_weights:
        kernel = functools.partial(_resident_kernel, num_pairs=L // 2, sub_m=sub_m,
                                   activation=activation)
        grid_spec = pltpu.PrefetchScalarGridSpec(
            num_scalar_prefetch=0,
            grid=(n_tiles,),
            in_specs=[
                # Activations: pipelined over the batch grid (tail tile masked by Pallas).
                pl.BlockSpec((tm, D_in), lambda i: (i, 0)),
                # Grid-invariant weights/biases: single-buffered (halves weight VMEM).
                pl.BlockSpec((D_in, H), lambda i: (0, 0), pipeline_mode=pl.Buffered(1)),
                pl.BlockSpec((1, H), lambda i: (0, 0), pipeline_mode=pl.Buffered(1)),
                pl.BlockSpec((L, H, H), lambda i: (0, 0, 0), pipeline_mode=pl.Buffered(1)),
                pl.BlockSpec((L, 1, H), lambda i: (0, 0, 0), pipeline_mode=pl.Buffered(1)),
            ],
            out_specs=pl.BlockSpec((tm, H), lambda i: (i, 0)),
        )
        dims = ("parallel",)
    else:
        kernel = functools.partial(_streaming_kernel, sub_m=sub_m, activation=activation)
        grid_spec = pltpu.PrefetchScalarGridSpec(
            num_scalar_prefetch=0,
            grid=(n_tiles, L // 2),
            in_specs=[
                pl.BlockSpec((tm, D_in), lambda i, p: (i, 0)),
                pl.BlockSpec((D_in, H), lambda i, p: (0, 0), pipeline_mode=pl.Buffered(1)),
                pl.BlockSpec((1, H), lambda i, p: (0, 0), pipeline_mode=pl.Buffered(1)),
                # Streamed per layer-pair; index_map changes with p, so keep default
                # double buffering (DMA of pair p+1 hidden behind pair p's matmuls).
                pl.BlockSpec((2, H, H), lambda i, p: (p, 0, 0)),
                pl.BlockSpec((2, 1, H), lambda i, p: (p, 0, 0)),
            ],
            out_specs=pl.BlockSpec((tm, H), lambda i, p: (i, 0)),
            scratch_shapes=[pltpu.VMEM((tm, H), jnp.float32)],   # h carried across pairs
        )
        dims = ("parallel", "arbitrary")

    return pl.pallas_call(
        kernel,
        out_shape=out_shape,
        grid_spec=grid_spec,
        compiler_params=pltpu.CompilerParams(
            dimension_semantics=dims, vmem_limit_bytes=vmem_limit),
        cost_estimate=cost,
    )(x, wp, bp, w_stack, b_stack)


# ----------------------------------------------------------------------------------
# Pure-JAX reference (mirrors the PyTorch forward in eval mode, normalizer=None)
# ----------------------------------------------------------------------------------
def resnet_layer_reference(x, wp, bp, w_stack, b_stack, activation="relu"):
    if activation == "relu":
        act = lambda v: jnp.maximum(v, 0.0)
    else:
        act = lambda v: v * jax.nn.sigmoid(v)
    h = x @ wp + bp.reshape(1, -1)
    L = w_stack.shape[0]
    for blk in range(L // 2):
        x0 = h
        t = act(h) @ w_stack[2 * blk] + b_stack[2 * blk].reshape(1, -1)
        t = act(t) @ w_stack[2 * blk + 1] + b_stack[2 * blk + 1].reshape(1, -1)
        h = x0 + t
    return h


if __name__ == "__main__":
    # Module-consistent small shapes:
    #   input_dim=32, hidden_sizes=[128,128,128,128] (2 residual blocks), batch=16.
    B, D_IN, H, L = 16, 32, 128, 4

    key = jax.random.PRNGKey(0)
    kx, kwp, kbp, kw, kb = jax.random.split(key, 5)

    x = jax.random.normal(kx, (B, D_IN), dtype=jnp.float32)
    wp = jax.random.uniform(kwp, (D_IN, H), jnp.float32,
                            minval=-1.0, maxval=1.0) / jnp.sqrt(D_IN)
    bp = jax.random.uniform(kbp, (1, H), jnp.float32,
                            minval=-1.0, maxval=1.0) / jnp.sqrt(D_IN)
    w_stack = jax.random.uniform(kw, (L, H, H), jnp.float32,
                                 minval=-1.0, maxval=1.0) / jnp.sqrt(H)
    b_stack = jax.random.uniform(kb, (L, 1, H), jnp.float32,
                                 minval=-1.0, maxval=1.0) / jnp.sqrt(H)

    ref = resnet_layer_reference(x, wp, bp, w_stack, b_stack)

    # 1) Exact f32 semantics, weight-resident path.
    params_f32 = prepare_resnet_params(wp, bp, w_stack, b_stack,
                                       weight_dtype=jnp.float32)
    out = jax.block_until_ready(resnet_layer_forward(x, params_f32))
    assert out.shape == (B, H)
    assert jnp.allclose(out, ref, atol=1e-4, rtol=1e-4), "f32 resident kernel mismatch"

    # 2) Forced weight-streaming path (2-D grid, per-layer-pair weight DMA), f32.
    out_s = jax.block_until_ready(
        resnet_layer_forward(x, params_f32, stream_weights=True))
    assert jnp.allclose(out_s, ref, atol=1e-4, rtol=1e-4), "f32 streaming kernel mismatch"

    # 3) Non-divisible batch exercises the masked tail tile (no pad copies in HBM).
    B2 = 20
    x2 = jax.random.normal(jax.random.PRNGKey(1), (B2, D_IN), dtype=jnp.float32)
    ref2 = resnet_layer_reference(x2, wp, bp, w_stack, b_stack)
    out2 = jax.block_until_ready(resnet_layer_forward(x2, params_f32))
    assert out2.shape == (B2, H)
    assert jnp.allclose(out2, ref2, atol=1e-4, rtol=1e-4), "tail-tile mismatch"

    # 4) Default bf16-weight MXU path (f32 accumulation), loose tolerance vs f32 ref.
    params_bf16 = prepare_resnet_params(wp, bp, w_stack, b_stack)   # bf16 default
    out_bf = jax.block_until_ready(resnet_layer_forward(x, params_bf16))
    assert out_bf.shape == (B, H)
    assert jnp.allclose(out_bf, ref, atol=1e-1, rtol=1e-1), "bf16 kernel mismatch"

    print("KERNEL_OK")
</pallas_src>

<mosaic_0001>
module attributes {stable_mosaic.version = 11 : i64} {
  func.func @_resident_kernel(%arg0: i32, %arg1: memref<8x32xf32, #tpu.memory_space<vmem>>, %arg2: memref<32x128xf32, #tpu.memory_space<vmem>>, %arg3: memref<1x128xf32, #tpu.memory_space<vmem>>, %arg4: memref<4x128x128xf32, #tpu.memory_space<vmem>>, %arg5: memref<4x1x128xf32, #tpu.memory_space<vmem>>, %arg6: memref<8x128xf32, #tpu.memory_space<vmem>>) attributes {dimension_semantics = [#tpu.dimension_semantics<parallel>], iteration_bounds = array<i64: 2>, scalar_prefetch = 0 : i64, scratch_operands = 0 : i64, tpu.core_type = #tpu.core_type<tc>, window_params = [{transform_indices = @transform_0, window_bounds = array<i64: 8, 32>}, {pipeline_mode = #tpu.pipeline_mode<synchronous>, transform_indices = @transform_1, window_bounds = array<i64: 32, 128>}, {pipeline_mode = #tpu.pipeline_mode<synchronous>, transform_indices = @transform_2, window_bounds = array<i64: 1, 128>}, {pipeline_mode = #tpu.pipeline_mode<synchronous>, transform_indices = @transform_3, window_bounds = array<i64: 4, 128, 128>}, {pipeline_mode = #tpu.pipeline_mode<synchronous>, transform_indices = @transform_4, window_bounds = array<i64: 4, 1, 128>}, {transform_indices = @transform_5, window_bounds = array<i64: 8, 128>}]} {
    %c0 = arith.constant 0 : index
    %c0_0 = arith.constant 0 : index
    %0 = vector.load %arg1[%c0, %c0_0] : memref<8x32xf32, #tpu.memory_space<vmem>>, vector<8x32xf32>
    %c0_1 = arith.constant 0 : index
    %c0_2 = arith.constant 0 : index
    %1 = vector.load %arg2[%c0_1, %c0_2] : memref<32x128xf32, #tpu.memory_space<vmem>>, vector<32x128xf32>
    %cst = arith.constant dense<0.000000e+00> : vector<8x128xf32>
    %2 = tpu.matmul %0, %1, %cst {dimension_numbers = #tpu.dot_dimension_numbers<[1], [0], [0], [1], [0, 0, 1, 1], [], []>} : vector<8x32xf32>, vector<32x128xf32>, vector<8x128xf32> -> vector<8x128xf32>
    %c0_3 = arith.constant 0 : index
    %c0_4 = arith.constant 0 : index
    %3 = vector.load %arg3[%c0_3, %c0_4] : memref<1x128xf32, #tpu.memory_space<vmem>>, vector<1x128xf32>
    %4 = vector.broadcast %3 : vector<1x128xf32> to vector<8x128xf32>
    %5 = arith.addf %2, %4 : vector<8x128xf32>
    %c0_5 = arith.constant 0 : index
    %c0_6 = arith.constant 0 : index
    %c0_7 = arith.constant 0 : index
    %6 = vector.load %arg4[%c0_5, %c0_6, %c0_7] : memref<4x128x128xf32, #tpu.memory_space<vmem>>, vector<1x128x128xf32>
    %7 = vector.shape_cast %6 : vector<1x128x128xf32> to vector<128x128xf32>
    %c0_8 = arith.constant 0 : index
    %c0_9 = arith.constant 0 : index
    %c0_10 = arith.constant 0 : index
    %8 = vector.load %arg5[%c0_8, %c0_9, %c0_10] : memref<4x1x128xf32, #tpu.memory_space<vmem>>, vector<1x1x128xf32>
    %9 = vector.shape_cast %8 : vector<1x1x128xf32> to vector<1x128xf32>
    %c1 = arith.constant 1 : index
    %c0_11 = arith.constant 0 : index
    %c0_12 = arith.constant 0 : index
    %10 = vector.load %arg4[%c1, %c0_11, %c0_12] : memref<4x128x128xf32, #tpu.memory_space<vmem>>, vector<1x128x128xf32>
    %11 = vector.shape_cast %10 : vector<1x128x128xf32> to vector<128x128xf32>
    %c1_13 = arith.constant 1 : index
    %c0_14 = arith.constant 0 : index
    %c0_15 = arith.constant 0 : index
    %12 = vector.load %arg5[%c1_13, %c0_14, %c0_15] : memref<4x1x128xf32, #tpu.memory_space<vmem>>, vector<1x1x128xf32>
    %13 = vector.shape_cast %12 : vector<1x1x128xf32> to vector<1x128xf32>
    %cst_16 = arith.constant 0.000000e+00 : f32
    %14 = vector.broadcast %cst_16 : f32 to vector<8x128xf32>
    %15 = arith.maximumf %5, %14 : vector<8x128xf32>
    %cst_17 = arith.constant dense<0.000000e+00> : vector<8x128xf32>
    %16 = tpu.matmul %15, %7, %cst_17 {dimension_numbers = #tpu.dot_dimension_numbers<[1], [0], [0], [1], [0, 0, 1, 1], [], []>} : vector<8x128xf32>, vector<128x128xf32>, vector<8x128xf32> -> vector<8x128xf32>
    %17 = vector.broadcast %9 : vector<1x128xf32> to vector<8x128xf32>
    %18 = arith.addf %16, %17 : vector<8x128xf32>
    %cst_18 = arith.constant 0.000000e+00 : f32
    %19 = vector.broadcast %cst_18 : f32 to vector<8x128xf32>
    %20 = arith.maximumf %18, %19 : vector<8x128xf32>
    %cst_19 = arith.constant dense<0.000000e+00> : vector<8x128xf32>
    %21 = tpu.matmul %20, %11, %cst_19 {dimension_numbers = #tpu.dot_dimension_numbers<[1], [0], [0], [1], [0, 0, 1, 1], [], []>} : vector<8x128xf32>, vector<128x128xf32>, vector<8x128xf32> -> vector<8x128xf32>
    %22 = vector.broadcast %13 : vector<1x128xf32> to vector<8x128xf32>
    %23 = arith.addf %21, %22 : vector<8x128xf32>
    %24 = arith.addf %5, %23 : vector<8x128xf32>
    %c2 = arith.constant 2 : index
    %c0_20 = arith.constant 0 : index
    %c0_21 = arith.constant 0 : index
    %25 = vector.load %arg4[%c2, %c0_20, %c0_21] : memref<4x128x128xf32, #tpu.memory_space<vmem>>, vector<1x128x128xf32>
    %26 = vector.shape_cast %25 : vector<1x128x128xf32> to vector<128x128xf32>
    %c2_22 = arith.constant 2 : index
    %c0_23 = arith.constant 0 : index
    %c0_24 = arith.constant 0 : index
    %27 = vector.load %arg5[%c2_22, %c0_23, %c0_24] : memref<4x1x128xf32, #tpu.memory_space<vmem>>, vector<1x1x128xf32>
    %28 = vector.shape_cast %27 : vector<1x1x128xf32> to vector<1x128xf32>
    %c3 = arith.constant 3 : index
    %c0_25 = arith.constant 0 : index
    %c0_26 = arith.constant 0 : index
    %29 = vector.load %arg4[%c3, %c0_25, %c0_26] : memref<4x128x128xf32, #tpu.memory_space<vmem>>, vector<1x128x128xf32>
    %30 = vector.shape_cast %29 : vector<1x128x128xf32> to vector<128x128xf32>
    %c3_27 = arith.constant 3 : index
    %c0_28 = arith.constant 0 : index
    %c0_29 = arith.constant 0 : index
    %31 = vector.load %arg5[%c3_27, %c0_28, %c0_29] : memref<4x1x128xf32, #tpu.memory_space<vmem>>, vector<1x1x128xf32>
    %32 = vector.shape_cast %31 : vector<1x1x128xf32> to vector<1x128xf32>
    %cst_30 = arith.constant 0.000000e+00 : f32
    %33 = vector.broadcast %cst_30 : f32 to vector<8x128xf32>
    %34 = arith.maximumf %24, %33 : vector<8x128xf32>
    %cst_31 = arith.constant dense<0.000000e+00> : vector<8x128xf32>
    %35 = tpu.matmul %34, %26, %cst_31 {dimension_numbers = #tpu.dot_dimension_numbers<[1], [0], [0], [1], [0, 0, 1, 1], [], []>} : vector<8x128xf32>, vector<128x128xf32>, vector<8x128xf32> -> vector<8x128xf32>
    %36 = vector.broadcast %28 : vector<1x128xf32> to vector<8x128xf32>
    %37 = arith.addf %35, %36 : vector<8x128xf32>
    %cst_32 = arith.constant 0.000000e+00 : f32
    %38 = vector.broadcast %cst_32 : f32 to vector<8x128xf32>
    %39 = arith.maximumf %37, %38 : vector<8x128xf32>
    %cst_33 = arith.constant dense<0.000000e+00> : vector<8x128xf32>
    %40 = tpu.matmul %39, %30, %cst_33 {dimension_numbers = #tpu.dot_dimension_numbers<[1], [0], [0], [1], [0, 0, 1, 1], [], []>} : vector<8x128xf32>, vector<128x128xf32>, vector<8x128xf32> -> vector<8x128xf32>
    %41 = vector.broadcast %32 : vector<1x128xf32> to vector<8x128xf32>
    %42 = arith.addf %40, %41 : vector<8x128xf32>
    %43 = arith.addf %24, %42 : vector<8x128xf32>
    %c0_34 = arith.constant 0 : index
    %c0_35 = arith.constant 0 : index
    %44 = vector.load %arg6[%c0_34, %c0_35] : memref<8x128xf32, #tpu.memory_space<vmem>>, vector<8x128xf32>
    tpu.vector_store %arg6[%c0_34, %c0_35], %43 {strides = array<i32>} : memref<8x128xf32, #tpu.memory_space<vmem>>, vector<8x128xf32>,
    return
  }
  func.func @transform_0(%arg0: i32) -> (i32, i32) {
    %c0_i32 = arith.constant 0 : i32
    %c0_i32_0 = arith.constant 0 : i32
    return %arg0, %c0_i32 : i32, i32
  }
  func.func @transform_1(%arg0: i32) -> (i32, i32) {
    %c0_i32 = arith.constant 0 : i32
    %c0_i32_0 = arith.constant 0 : i32
    %c0_i32_1 = arith.constant 0 : i32
    return %c0_i32, %c0_i32_0 : i32, i32
  }
  func.func @transform_2(%arg0: i32) -> (i32, i32) {
    %c0_i32 = arith.constant 0 : i32
    %c0_i32_0 = arith.constant 0 : i32
    %c0_i32_1 = arith.constant 0 : i32
    return %c0_i32, %c0_i32_0 : i32, i32
  }
  func.func @transform_3(%arg0: i32) -> (i32, i32, i32) {
    %c0_i32 = arith.constant 0 : i32
    %c0_i32_0 = arith.constant 0 : i32
    %c0_i32_1 = arith.constant 0 : i32
    %c0_i32_2 = arith.constant 0 : i32
    return %c0_i32, %c0_i32_0, %c0_i32_1 : i32, i32, i32
  }
  func.func @transform_4(%arg0: i32) -> (i32, i32, i32) {
    %c0_i32 = arith.constant 0 : i32
    %c0_i32_0 = arith.constant 0 : i32
    %c0_i32_1 = arith.constant 0 : i32
    %c0_i32_2 = arith.constant 0 : i32
    return %c0_i32, %c0_i32_0, %c0_i32_1 : i32, i32, i32
  }
  func.func @transform_5(%arg0: i32) -> (i32, i32) {
    %c0_i32 = arith.constant 0 : i32
    %c0_i32_0 = arith.constant 0 : i32
    return %arg0, %c0_i32 : i32, i32
  }
}

</mosaic_0001>

<bundles_post_ra>
// kernel: tpu_custom_call.1
= control target key start
LH: loop header
LB: loop body
LE: loop exit
PB: predicated region body
PF: predicated region fallthrough
CT: control target
= control target key end

     0   :  { %10 = vsyncpa [#allocation3], 0  ;;  %s1118_s0 = inlined_call_operand.hbm [shape: f32[16,32], index: 0, kind: input, shape index: {}]   ;;  %s1119_s1 = inlined_call_operand.hbm [shape: f32[32,128], index: 1, kind: input, shape index: {}]   ;;  %s1120_s2 = inlined_call_operand.vmem [shape: f32[1,128], index: 2, kind: input, shape index: {}]   ;;  %s1121_s3 = inlined_call_operand.hbm [shape: f32[4,128,128], index: 3, kind: input, shape index: {}]   ;;  %s1122_s4 = inlined_call_operand.hbm [shape: f32[4,1,128], index: 4, kind: input, shape index: {}]   ;;  %s1123_s5 = inlined_call_operand.hbm [shape: f32[16,128], index: 5, kind: output, shape index: {}]  }
   0x1   :  { %12 = vsyncpa [#allocation3 + $0x1], 0 }
   0x2   :  { %13 = vsyncpa [#allocation6], 0 }
   0x3   :  { %14 = vsyncpa [#allocation9], 0 }
   0x4   :  { %15 = vsyncpa [#allocation4], 0 }
   0x5   :  { %17 = vsyncpa [#allocation4 + $0x1], 0  ;;  %s951_s18 = smov 0   ;;  %s953_s19 = smov 0  }
   0x6   :  { %s955_s20 = smov 0   ;;  %s957_s21 = smov 0  }
   0x7 LB: > { %s175_s24 = sshll.u32 %s1119_s1, 4  ;;  %s975_s25 = sadd.s32 4294967295, %s912_s21   ;;  %s912_s21 = sphi %s957_s21, %s1134_s21   ;;  %s908_s20 = sphi %s955_s20, %s1133_s20   ;;  %s904_s19 = sphi %s953_s19, %s1132_s19   ;;  %s900_s18 = sphi %s951_s18, %s1131_s18   ;;  %s176_s24 = int_to_ptr.hbm [resolvable:$true] %s175_s24 }
   0x8   : > { %p614_p0 = scmp.ge.s32.totalorder %s912_s21, 1  ;;  %p44_p1 = scmp.eq.s32.totalorder %s975_s25, 0 }
   0x9   : > { %p164_p2 = scmp.lt.s32.totalorder %s912_s21, 3  ;;  %s914_s27 = smov [#allocation5]  }
   0xa   : > { %s177_s28 = sshll.u32 %s914_s27, 4  ;;  %s192_s6 = sshll.u32 %s1121_s3, 4  ;;  %s178_s28 = int_to_ptr.vmem [resolvable:$true] %s177_s28  ;;  %s193_s6 = int_to_ptr.hbm [resolvable:$true] %s192_s6 }
   0xb   : > { %p980_p3 = pnand %p614_p0, %p164_p2  ;;  %s206_s10 = sshll.u32 %s1122_s4, 4  ;;  %s207_s10 = int_to_ptr.hbm [resolvable:$true] %s206_s10 }
   0xc   : > { %s915_s11 = smov [#allocation7]   ;;  %s916_s13 = smov 128  }
   0xd   : > { %p648_p4 = pneg %p980_p3  ;;  %s194_s12 = sshll.u32 %s915_s11, 4  ;;  %s195_s12 = int_to_ptr.vmem [resolvable:$true] %s194_s12 }
   0xe   : > { %s917_s14 = smov 8   ;;  %s918_s15 = smov [#allocation8]  }
   0xf   : > { %p992_p6 = pnand %p648_p4, %p44_p1  ;;  %s208_s16 = sshll.u32 %s918_s15, 4  ;;  %s209_s16 = int_to_ptr.vmem [resolvable:$true] %s208_s16 }
  0x10   : > { %s919_s17 = smov 16   ;;  %s920_s22 = smov 1  }
  0x11   : > { %651 = dma.hbm_to_vmem [thread:$0]  (!%p992_p6), %s176_s24, 512, %s178_s28, [#allocation6], %s916_s13, %s916_s13, %s917_s14  }
  0x12   : > { %654 = dma.hbm_to_vmem [thread:$0]  (!%p992_p6), %s193_s6, 8192, %s195_s12, [#allocation6], %s916_s13, %s916_s13, %s917_s14  }
  0x13   : > { %657 = dma.hbm_to_vmem [thread:$0]  (!%p992_p6), %s207_s10, 64, %s209_s16, [#allocation9], %s919_s17, %s919_s17, %s920_s22  }
  0x14   : > { %s613_s23 = sadd.s32 4294967294, %s912_s21   ;;  %s1007_s24 = sadd.s32 1, %s912_s21  }
  0x15   : > { %s30_s27 = sadd.s32 1, %s908_s20  ;;  %s27_s28 = ssub.s32 %s912_s21, %s1007_s24 }
  0x16   : > { %p37_p7 = scmp.ne.s32.totalorder %s908_s20, %s904_s19  ;;  %p28_p8 = scmp.eq.s32.totalorder %s27_s28, 0 }
  0x17   : > { %p38_p9 = scmp.eq.s32.totalorder %s912_s21, 0  ;;  %p43_p10 = scmp.ne.s32.totalorder %s904_s19, %s900_s18 }
  0x18   : > { %p151_p11 = scmp.eq.s32.totalorder %s975_s25, 1  ;;  %p157_p0 = scmp.eq.s32.totalorder %s613_s23, 1 }
  0x19   : > { %s1019_s29 = scalar_select %p28_p8, %s908_s20, %s30_s27  }
  0x1a   : > { %p1023_p12 = por %p44_p1, %p43_p10  ;;  %p1027_p13 = por %p151_p11, %p37_p7 }
  0x1b   : > { %p39_p2 = por %p38_p9, %p37_p7  ;;  %s222_s7 = sand.u32 1, %s908_s20  }
  0x1c   : > { %p1032_p4 = por %p157_p0, %p43_p10  ;;  %p669_p6 = scmp.lt.s32.totalorder %s912_s21, 2 }
  0x1d   : > { %s619_s9 = sshll.u32 %s222_s7, 3  ;;  %s620_s10 = sshll.u32 %s912_s21, 3 }
  0x1e   : > { %s230_s13 = scalar_lea.hbm %s1118_s0, %s620_s10  ;;  %s226_s15 = scalar_lea.vmem [#allocation2], %s619_s9 }
  0x1f   : > { %s232_s14 = sshll.u32 %s230_s13, 4  ;;  %s234_s16 = sshll.u32 %s226_s15, 4  ;;  %s233_s14 = int_to_ptr.hbm [resolvable:$true] %s232_s14  ;;  %s235_s16 = int_to_ptr.vmem [resolvable:$true] %s234_s16 }
  0x20   : > { %p1041_p8 = pnand %p669_p6, %p39_p2  ;;  %s223_s22 = scalar_lea.sflag [#allocation3], %s222_s7 }
  0x21   : > { %s808_s23 = sshra.s32 %s233_s14, 4  ;;  %s815_s9 = scalar_lea.hbm %s1118_s0, 16  ;;  %s809_s23 = int_to_ptr.hbm [resolvable:$true] %s808_s23 }
  0x22   : > { %s810_s27 = scalar_lea.hbm %s809_s23, 8  ;;  %p812_p9 = pneg %p1041_p8 }
  0x23   : > { %p811_p7 = scmp.ne.s32.totalorder %s809_s23, %s810_s27  ;;  %p816_p0 = scmp.lt.s32.totalorder %s809_s23, %s1118_s0 }
  0x24   : > { %p817_p2 = scmp.lt.s32.totalorder %s815_s9, %s810_s27 }
  0x25   : > { %p813_p10 = pnand %p812_p9, %p811_p7 }
  0x26   : > { %p818_p6 = por %p817_p2, %p816_p0 }
  0x27   : > { %p814_p11 = pneg %p813_p10 }
  0x29   : > { %p819_p5 = pnand %p818_p6, %p814_p11 }
  0x2b   : > { %822 = shalt.err (!%p819_p5)
}
  0x2c   : > { %661 = dma.hbm_to_vmem [thread:$0]  (!%p1041_p8), %s233_s14, 128, %s235_s16, %s223_s22  }
  0x2d   : > { %243 = sbr.rel (%p980_p3) target bundleno = 730 (0x2da), region = 40  ;;  %s1058_s7 = sand.u32 (!%p980_p3), 1, %s904_s19  }
  0x2e   : > { %s622_s13 = sshll.u32 (!%p980_p3), %s1058_s7, 3  ;;  %s246_s15 = scalar_lea.sflag (!%p980_p3), [#allocation3], %s1058_s7 }
  0x2f   : > { %s249_s23 = scalar_lea.vmem (!%p980_p3), [#allocation2], %s622_s13 }
  0x32   : > { %883 = dma.done.wait (%p1023_p12), %s246_s15, 128  }
  0x33   : > { %885 = vsyncadd (%p1023_p12), %s246_s15, 4294967168 }
  0x34   : > { %887 = dma.done.wait (%p44_p1), [#allocation6], 8704  }
  0x35   : > { %889 = vsyncadd (%p44_p1), [#allocation6], 4294958592 }
  0x36   : > { %891 = dma.done.wait (%p44_p1), [#allocation9], 64  }
  0x37   : > { %893 = vsyncadd (%p44_p1), [#allocation9], 4294967232  ;;  %v296_v0 = vld [vmem:[#allocation5 + $0x18] sm:$0xff]  ;;  %v295_v1 = vld [vmem:[#allocation5 + $0x10] sm:$0xff]  ;;  %vm301_vm0 = vcmask 261120   ;;  %s629_s14 = sshll.u32 %s975_s25, 3 }
  0x38   : > { %317 = vmatpush.msra.mxu0 %v296_v0  ;;  %v340_v2 = vld [vmem:[#allocation7 + $0x78] sm:$0xff]  ;;  %v294_v3 = vld [vmem:[#allocation5 + $0x8] sm:$0xff]  ;;  %v339_v4 = vld [vmem:[#allocation7 + $0x70] sm:$0xff]  ;;  %s509_s22 = scalar_lea.hbm %s1123_s5, %s629_s14  ;;  %s291_s27 = scalar_lea.vmem [#allocation10], %s622_s13 }
  0x39   : > { %365 = vmatpush.msra.mxu1 %v340_v2  ;;  %v338_v5 = vld [vmem:[#allocation7 + $0x68] sm:$0xff]  ;;  %v293_v6 = vld [vmem:[#allocation5] sm:$0xff]  ;;  %v292_v7 = vld [vmem:[%s249_s23] sm:$0xff]  ;;  %s511_s28 = sshll.u32 %s291_s27, 4  ;;  %s513_s10 = sshll.u32 %s509_s22, 4  ;;  %s512_s28 = int_to_ptr.vmem [resolvable:$true] %s511_s28  ;;  %s514_s10 = int_to_ptr.hbm [resolvable:$true] %s513_s10 }
  0x3a   : > { %318 = vmatpush.msra.mxu0 %v295_v1  ;;  %v337_v8 = vld [vmem:[#allocation7 + $0x60] sm:$0xff]  ;;  %v336_v9 = vld [vmem:[#allocation7 + $0x58] sm:$0xff]  ;;  %v335_v10 = vld [vmem:[#allocation7 + $0x50] sm:$0xff]  ;;  %s499_s9 = scalar_lea.sflag [#allocation4], %s1058_s7  ;;  %s852_s11 = sshra.s32 %s514_s10, 4  ;;  %s853_s11 = int_to_ptr.hbm [resolvable:$true] %s852_s11 }
  0x3b   : > { %366 = vmatpush.msra.mxu1 %v339_v4  ;;  %v334_v11 = vld [vmem:[#allocation7 + $0x48] sm:$0xff]  ;;  %v333_v12 = vld [vmem:[#allocation7 + $0x40] sm:$0xff]  ;;  %v332_v13 = vld [vmem:[#allocation7 + $0x38] sm:$0xff]  ;;  %s854_s25 = scalar_lea.hbm %s853_s11, 8  ;;  %s858_s23 = scalar_lea.hbm %s1123_s5, 16 }
  0x3c   : > { %319 = vmatpush.msra.mxu0 %v294_v3  ;;  %v331_v14 = vld [vmem:[#allocation7 + $0x30] sm:$0xff]  ;;  %v330_v15 = vld [vmem:[#allocation7 + $0x28] sm:$0xff]  ;;  %v329_v16 = vld [vmem:[#allocation7 + $0x20] sm:$0xff]  ;;  %p855_p1 = scmp.ne.s32.totalorder %s853_s11, %s854_s25  ;;  %p859_p12 = scmp.lt.s32.totalorder %s853_s11, %s1123_s5 }
  0x3d   : > { %367 = vmatpush.msra.mxu1 %v338_v5  ;;  %v328_v17 = vld [vmem:[#allocation7 + $0x18] sm:$0xff]  ;;  %v327_v18 = vld [vmem:[#allocation7 + $0x10] sm:$0xff]  ;;  %v326_v19 = vld [vmem:[#allocation7 + $0x8] sm:$0xff]  ;;  %p860_p8 = scmp.lt.s32.totalorder %s858_s23, %s854_s25 }
  0x3e   : > { %320 = vmatpush.msra.mxu0 %v293_v6  ;;  %v325_v20 = vld [vmem:[#allocation7] sm:$0xff]  ;;  %v358_v21 = vld [vmem:[#allocation7 + $0xf8] sm:$0xff]  ;;  %v357_v22 = vld [vmem:[#allocation7 + $0xf0] sm:$0xff]  ;;  %p856_p3 = pnand %p855_p1, %p1027_p13 }
  0x3f   : > { %627 = vmatmul.msk.f32.vlgmr.msra.gmra.mxu0 %vm301_vm0, %v292_v7  ;;  %368 = vmatpush.msra.mxu1 %v337_v8  ;;  %v356_v23 = vld [vmem:[#allocation7 + $0xe8] sm:$0xff]  ;;  %v355_v24 = vld [vmem:[#allocation7 + $0xe0] sm:$0xff]  ;;  %v354_v25 = vld [vmem:[#allocation7 + $0xd8] sm:$0xff]  ;;  %p861_p7 = por %p860_p8, %p859_p12 }
  0x40   : > { %389 = vmatpush.msra.mxu2 %v358_v21  ;;  %v353_v26 = vld [vmem:[#allocation7 + $0xd0] sm:$0xff]  ;;  %v352_v27 = vld [vmem:[#allocation7 + $0xc8] sm:$0xff]  ;;  %v351_v28 = vld [vmem:[#allocation7 + $0xc0] sm:$0xff]  ;;  %p857_p5 = pneg %p856_p3 }
  0x41   : > { %369 = vmatpush.msra.mxu1 %v336_v9  ;;  %v350_v29 = vld [vmem:[#allocation7 + $0xb8] sm:$0xff]  ;;  %v349_v30 = vld [vmem:[#allocation7 + $0xb0] sm:$0xff]  ;;  %v348_v31 = vld [vmem:[#allocation7 + $0xa8] sm:$0xff] }
  0x42   : > { %390 = vmatpush.msra.mxu2 %v357_v22  ;;  %v347_v32 = vld [vmem:[#allocation7 + $0xa0] sm:$0xff]  ;;  %v346_v33 = vld [vmem:[#allocation7 + $0x98] sm:$0xff]  ;;  %v713_v34 = vld [vmem:[%s1120_s2] ss:$0 sm:$0xff]  ;;  %p862_p9 = pnand %p861_p7, %p857_p5 }
  0x43   : > { %370 = vmatpush.msra.mxu1 %v335_v10  ;;  %v345_v38 = vld [vmem:[#allocation7 + $0x90] sm:$0xff]  ;;  %v344_v39 = vld [vmem:[#allocation7 + $0x88] sm:$0xff]  ;;  %v343_v40 = vld [vmem:[#allocation7 + $0x80] sm:$0xff] }
  0x44   : > { %391 = vmatpush.msra.mxu2 %v356_v23  ;;  %v426_v41 = vld [vmem:[#allocation7 + $0x178] sm:$0xff]  ;;  %v425_v42 = vld [vmem:[#allocation7 + $0x170] sm:$0xff]  ;;  %v424_v43 = vld [vmem:[#allocation7 + $0x168] sm:$0xff] }
  0x45   : > { %371 = vmatpush.msra.mxu1 %v334_v11  ;;  %452 = vmatpush.msra.mxu3 %v426_v41  ;;  %v423_v44 = vld [vmem:[#allocation7 + $0x160] sm:$0xff]  ;;  %v422_v45 = vld [vmem:[#allocation7 + $0x158] sm:$0xff]  ;;  %v421_v46 = vld [vmem:[#allocation7 + $0x150] sm:$0xff] }
  0x46   : > { %392 = vmatpush.msra.mxu2 %v355_v24  ;;  %v420_v47 = vld [vmem:[#allocation7 + $0x148] sm:$0xff]  ;;  %v419_v48 = vld [vmem:[#allocation7 + $0x140] sm:$0xff]  ;;  %v418_v49 = vld [vmem:[#allocation7 + $0x138] sm:$0xff] }
  0x47   : > { %372 = vmatpush.msra.mxu1 %v333_v12  ;;  %453 = vmatpush.msra.mxu3 %v425_v42  ;;  %v417_v50 = vld [vmem:[#allocation7 + $0x130] sm:$0xff]  ;;  %v416_v51 = vld [vmem:[#allocation7 + $0x128] sm:$0xff]  ;;  %v415_v52 = vld [vmem:[#allocation7 + $0x120] sm:$0xff] }
  0x48   : > { %393 = vmatpush.msra.mxu2 %v354_v25  ;;  %v714_v53 = vld [vmem:[#allocation8] ss:$0 sm:$0xff]  ;;  %v414_v57 = vld [vmem:[#allocation7 + $0x118] sm:$0xff]  ;;  %v413_v58 = vld [vmem:[#allocation7 + $0x110] sm:$0xff] }
  0x49   : > { %373 = vmatpush.msra.mxu1 %v332_v13  ;;  %454 = vmatpush.msra.mxu3 %v424_v43  ;;  %v412_v59 = vld [vmem:[#allocation7 + $0x108] sm:$0xff]  ;;  %v411_v60 = vld [vmem:[#allocation7 + $0x100] sm:$0xff]  ;;  %v445_v61 = vld [vmem:[#allocation7 + $0x1f8] sm:$0xff] }
  0x4a   : > { %394 = vmatpush.msra.mxu2 %v353_v26  ;;  %v444_v62 = vld [vmem:[#allocation7 + $0x1f0] sm:$0xff]  ;;  %476 = vmatpush.msrb.mxu0 %v445_v61  ;;  %v443_v63 = vld [vmem:[#allocation7 + $0x1e8] sm:$0xff]  ;;  %v442_v0 = vld [vmem:[#allocation7 + $0x1e0] sm:$0xff] }
  0x4b   : > { %374 = vmatpush.msra.mxu1 %v331_v14  ;;  %455 = vmatpush.msra.mxu3 %v423_v44  ;;  %v441_v1 = vld [vmem:[#allocation7 + $0x1d8] sm:$0xff]  ;;  %v440_v2 = vld [vmem:[#allocation7 + $0x1d0] sm:$0xff]  ;;  %v439_v3 = vld [vmem:[#allocation7 + $0x1c8] sm:$0xff] }
  0x4c   : > { %395 = vmatpush.msra.mxu2 %v352_v27  ;;  %477 = vmatpush.msrb.mxu0 %v444_v62  ;;  %v438_v4 = vld [vmem:[#allocation7 + $0x1c0] sm:$0xff]  ;;  %v437_v5 = vld [vmem:[#allocation7 + $0x1b8] sm:$0xff]  ;;  %v436_v6 = vld [vmem:[#allocation7 + $0x1b0] sm:$0xff] }
  0x4d   : > { %375 = vmatpush.msra.mxu1 %v330_v15  ;;  %456 = vmatpush.msra.mxu3 %v422_v45  ;;  %v435_v7 = vld [vmem:[#allocation7 + $0x1a8] sm:$0xff]  ;;  %v434_v8 = vld [vmem:[#allocation7 + $0x1a0] sm:$0xff]  ;;  %v433_v10 = vld [vmem:[#allocation7 + $0x198] sm:$0xff] }
  0x4e   : > { %396 = vmatpush.msra.mxu2 %v351_v28  ;;  %478 = vmatpush.msrb.mxu0 %v443_v63  ;;  %v715_v9 = vld [vmem:[#allocation8 + $0x1] ss:$0 sm:$0xff]  ;;  %v432_v15 = vld [vmem:[#allocation7 + $0x190] sm:$0xff]  ;;  %v717_v22 = vld [vmem:[#allocation8 + $0x3] ss:$0 sm:$0xff] }
  0x4f   : > { %376 = vmatpush.msra.mxu1 %v329_v16  ;;  %457 = vmatpush.msra.mxu3 %v421_v46  ;;  %v431_v16 = vld [vmem:[#allocation7 + $0x188] sm:$0xff] }
  0x50   : > { %397 = vmatpush.msra.mxu2 %v350_v29  ;;  %479 = vmatpush.msrb.mxu0 %v442_v0 }
  0x51   : > { %377 = vmatpush.msra.mxu1 %v328_v17  ;;  %458 = vmatpush.msra.mxu3 %v420_v47  ;;  %v430_v17 = vld [vmem:[#allocation7 + $0x180] sm:$0xff] }
  0x52   : > { %398 = vmatpush.msra.mxu2 %v349_v30  ;;  %480 = vmatpush.msrb.mxu0 %v441_v1 }
  0x53   : > { %378 = vmatpush.msra.mxu1 %v327_v18  ;;  %459 = vmatpush.msra.mxu3 %v419_v48  ;;  %v716_v18 = vld [vmem:[#allocation8 + $0x2] ss:$0 sm:$0xff] }
  0x54   : > { %399 = vmatpush.msra.mxu2 %v348_v31  ;;  %481 = vmatpush.msrb.mxu0 %v440_v2 }
  0x55   : > { %379 = vmatpush.msra.mxu1 %v326_v19  ;;  %460 = vmatpush.msra.mxu3 %v418_v49 }
  0x56   : > { %400 = vmatpush.msra.mxu2 %v347_v32  ;;  %482 = vmatpush.msrb.mxu0 %v439_v3 }
  0x57   : > { %380 = vmatpush.msra.mxu1 %v325_v20  ;;  %461 = vmatpush.msra.mxu3 %v417_v50 }
  0x58   : > { %401 = vmatpush.msra.mxu2 %v346_v33  ;;  %483 = vmatpush.msrb.mxu0 %v438_v4 }
  0x59   : > { %462 = vmatpush.msra.mxu3 %v416_v51 }
  0x5a   : > { %402 = vmatpush.msra.mxu2 %v345_v38  ;;  %484 = vmatpush.msrb.mxu0 %v437_v5 }
  0x5b   : > { %463 = vmatpush.msra.mxu3 %v415_v52 }
  0x5c   : > { %403 = vmatpush.msra.mxu2 %v344_v39  ;;  %485 = vmatpush.msrb.mxu0 %v436_v6 }
  0x5d   : > { %464 = vmatpush.msra.mxu3 %v414_v57 }
  0x5e   : > { %404 = vmatpush.msra.mxu2 %v343_v40  ;;  %486 = vmatpush.msrb.mxu0 %v435_v7 }
  0x5f   : > { %465 = vmatpush.msra.mxu3 %v413_v58 }
  0x60   : > { %487 = vmatpush.msrb.mxu0 %v434_v8 }
  0x61   : > { %466 = vmatpush.msra.mxu3 %v412_v59 }
  0x62   : > { %488 = vmatpush.msrb.mxu0 %v433_v10 }
  0x63   : > { %467 = vmatpush.msra.mxu3 %v411_v60 }
  0x64   : > { %489 = vmatpush.msrb.mxu0 %v432_v15 }
  0x66   : > { %490 = vmatpush.msrb.mxu0 %v431_v16 }
  0x68   : > { %491 = vmatpush.msrb.mxu0 %v430_v17 }
  0xbc   : > { %v322_v35 = vpop.f32.mrf.mxu0 }
  0xbd   : > { %v1079_v36 = vadd.f32 %v713_v34, %v322_v35 }
  0xbf   : > { %v361_v37 = vmax.f32 %v1079_v36, 0.0 }
  0xc1   : > { %381 = vmatmul.f32.vlgmr.msra.gmra.mxu1 %v361_v37 }
 0x13e   : > { %v382_v54 = vpop.f32.mrf.mxu1 }
 0x13f   : > { %v383_v55 = vadd.f32 %v714_v53, %v382_v54 }
 0x141   : > { %v385_v56 = vmax.f32 %v383_v55, 0.0 }
 0x143   : > { %405 = vmatmul.f32.vlgmr.msra.gmra.mxu2 %v385_v56 }
 0x1c6   : > { %v406_v11 = vpop.f32.mrf.mxu2 }
 0x1c7   : > { %v407_v12 = vadd.f32 %v715_v9, %v406_v11 }
 0x1c9   : > { %v409_v13 = vadd.f32 %v407_v12, %v1079_v36 }
 0x1cb   : > { %v448_v14 = vmax.f32 %v409_v13, 0.0 }
 0x1cd   : > { %468 = vmatmul.f32.vlgmr.msra.gmra.mxu3 %v448_v14 }
 0x250   : > { %v469_v19 = vpop.f32.mrf.mxu3 }
 0x251   : > { %v470_v20 = vadd.f32 %v716_v18, %v469_v19 }
 0x253   : > { %v472_v21 = vmax.f32 %v470_v20, 0.0 }
 0x255   : > { %492 = vmatmul.f32.vlgmr.msrb.gmra.mxu0 %v472_v21 }
 0x2d2   : > { %v493_v23 = vpop.f32.mrf.mxu0 }
 0x2d3   : > { %v494_v24 = vadd.f32 %v717_v22, %v493_v23 }
 0x2d5   : > { %v496_v25 = vadd.f32 %v494_v24, %v409_v13 }
 0x2d7   : > { %497 = vst [vmem:[%s291_s27] sm:$0xff] %v496_v25 }
 0x2d8   : > { %865 = shalt.err (!%p862_p9)
}
 0x2d9   : > { %646 = dma.vmem_to_hbm [thread:$0]  (%p1027_p13), %s512_s28, 128, %s514_s10, %s499_s9  }
 0x2da PF: > { %s525_s7 = sand.u32 1, %s900_s18   ;;  %p1130_p10 = scmp.ge.s32.totalorder %s912_s21, 2 }
 0x2db   : > { %s526_s30 = scalar_lea.sflag [#allocation4], %s525_s7 }
 0x2dc   : > { %p663_p11 = pnand %p1130_p10, %p1032_p4 }
 0x2de   : > { %p664_p0 = pneg %p663_p11 }
 0x2e0   : > { %895 = dma.done.wait (%p664_p0), %s526_s30, 128  }
 0x2e1   : > { %897 = vsyncadd (%p664_p0), %s526_s30, 4294967168  ;;  %p20_p2 = scmp.ge.s32.totalorder %s1007_s24, 4   ;;  %s1131_s18 = smov %s904_s19 }
 0x2e2   : > { %s1132_s19 = smov %s908_s20  ;;  %s1133_s20 = smov %s1019_s29 }
 0x2e3   : > { %s1134_s21 = smov %s1007_s24  ;;  %22 = sbr.rel (!%p20_p2) target bundleno = 7 (0x7), region = 103 }
 0x2e8   :  { %532 = vsyncpa [#allocation3], 1 }
 0x2e9   :  { %534 = vsyncpa [#allocation3 + $0x1], 1 }
 0x2ea   :  { %535 = vsyncpa [#allocation6], 1 }
 0x2eb   :  { %536 = vsyncpa [#allocation9], 1 }
 0x2ec   :  { %537 = vsyncpa [#allocation4], 1 }
 0x2ed   :  { %539 = vsyncpa [#allocation4 + $0x1], 1 }

</bundles_post_ra>
